<compile_context>
chip_gen: v7x
topology: tpu7x:2x2x1
jax: 0.10.0
libtpu: 0.0.40
codegen_flags: <defaults>
</compile_context>

<pallas_src>
import functools
import math

import jax
import jax.numpy as jnp
from jax.experimental import pallas as pl
from jax.experimental.pallas import tpu as pltpu


_NEG_BIG = -1e30                       # finite "minus infinity" for the running max (avoids NaN)
_LANES = 128                           # lane width for lane-replicated softmax statistics
_VMEM_LIMIT = 48 * 1024 * 1024         # safe on v5e/v6e (128 MiB) and v7x (64 MiB physical)
_RESIDENT_W_BYTES = 6 * 1024 * 1024    # weights below this stay fully VMEM-resident


def _pick_tile(dim, pref, align):
    """Largest divisor of `dim` that is <= pref and a multiple of `align`; else the full dim."""
    if dim <= pref:
        return dim
    for t in range(pref, align - 1, -1):
        if dim % t == 0 and t % align == 0:
            return t
    # TODO(synk): pad + mask instead of falling back to the full (possibly VMEM-heavy) dim.
    return dim


# ----------------------------- QKV projection (matmul + bias) -----------------------------

def _linear_bias_resident_kernel(x_ref, w_ref, b_ref, o_ref):
    x = x_ref[...].astype(jnp.bfloat16)                       # activations -> bf16 MXU operands
    acc = jnp.dot(x, w_ref[...], preferred_element_type=jnp.float32)
    o_ref[...] = (acc + b_ref[...]).astype(o_ref.dtype)


def _linear_bias_tiled_kernel(x_ref, w_ref, b_ref, o_ref, acc_ref):
    kk = pl.program_id(2)

    @pl.when(kk == 0)
    def _init():
        acc_ref[...] = jnp.zeros_like(acc_ref)

    acc_ref[...] += jnp.dot(x_ref[...].astype(jnp.bfloat16), w_ref[...],
                            preferred_element_type=jnp.float32)

    @pl.when(kk == pl.num_programs(2) - 1)
    def _store():
        o_ref[...] = (acc_ref[...] + b_ref[...]).astype(o_ref.dtype)


def linear_bias(x2d, w, b, *, out_dtype, tm=256, tn=512, tk=512):
    """out = x2d @ w + b.  `w` is bf16, `b` is f32 (added post-accumulation in f32)."""
    M, K = x2d.shape
    _, N = w.shape
    tm = _pick_tile(M, tm, 8)
    cost = pl.CostEstimate(
        flops=2 * M * N * K, transcendentals=0,
        bytes_accessed=M * K * x2d.dtype.itemsize + K * N * w.dtype.itemsize
        + M * N * jnp.dtype(out_dtype).itemsize)

    if K * N * w.dtype.itemsize <= _RESIDENT_W_BYTES:
        # Weight panel fully resident in VMEM; grid over rows only (no K re-streaming,
        # no per-k accumulator init/finalize).
        return pl.pallas_call(
            _linear_bias_resident_kernel,
            out_shape=jax.ShapeDtypeStruct((M, N), out_dtype),
            grid=(M // tm,),
            in_specs=[
                pl.BlockSpec((tm, K), lambda i: (i, 0)),
                pl.BlockSpec((K, N), lambda i: (0, 0)),
                pl.BlockSpec((1, N), lambda i: (0, 0)),
            ],
            out_specs=pl.BlockSpec((tm, N), lambda i: (i, 0)),
            compiler_params=pltpu.CompilerParams(
                dimension_semantics=("parallel",), vmem_limit_bytes=_VMEM_LIMIT),
            cost_estimate=cost,
        )(x2d, w, b)

    # Large-weight fallback: stream K/N tiles with an f32 VMEM accumulator.
    tn = _pick_tile(N, tn, 128)
    tk = _pick_tile(K, tk, 128)
    return pl.pallas_call(
        _linear_bias_tiled_kernel,
        out_shape=jax.ShapeDtypeStruct((M, N), out_dtype),
        grid=(M // tm, N // tn, K // tk),
        in_specs=[
            pl.BlockSpec((tm, tk), lambda i, j, k: (i, k)),
            pl.BlockSpec((tk, tn), lambda i, j, k: (k, j)),
            pl.BlockSpec((1, tn), lambda i, j, k: (0, j)),
        ],
        out_specs=pl.BlockSpec((tm, tn), lambda i, j, k: (i, j)),
        scratch_shapes=[pltpu.VMEM((tm, tn), jnp.float32)],
        compiler_params=pltpu.CompilerParams(
            dimension_semantics=("parallel", "parallel", "arbitrary"),
            vmem_limit_bytes=_VMEM_LIMIT),
        cost_estimate=cost,
    )(x2d, w, b)


# ----------------------------- Flash attention (online softmax) -----------------------------

def _flash_attn_kernel(q_ref, k_ref, v_ref, bias_ref, o_ref, m_sc, l_sc, acc_sc,
                       *, n_head, d_head):
    ki = pl.program_id(2)

    @pl.when(ki == 0)
    def _init():
        m_sc[...] = jnp.full_like(m_sc, _NEG_BIG)
        l_sc[...] = jnp.zeros_like(l_sc)
        acc_sc[...] = jnp.zeros_like(acc_sc)

    q = q_ref[...]                                    # (tq,  H*D) bf16 (scale folded into W_qkv)
    k = k_ref[...]                                    # (tkv, H*D) bf16
    v = v_ref[...]                                    # (tkv, H*D) bf16
    bias = bias_ref[...].astype(jnp.float32)          # (1, tkv) additive SDPA float mask

    # Per-head Q.K^T on the MXU (contract over d), f32 accumulation.  Heads stacked on a
    # leading major axis so the online softmax below stays fully vectorized across heads.
    s = jnp.stack(
        [jax.lax.dot_general(
            q[:, h * d_head:(h + 1) * d_head], k[:, h * d_head:(h + 1) * d_head],
            (((1,), (1,)), ((), ())), preferred_element_type=jnp.float32)
         for h in range(n_head)], axis=0)             # (H, tq, tkv)
    s = s + bias[None, :, :]                          # broadcast over heads and query positions

    m_prev = m_sc[...]                                # (H, tq, 128) lane-replicated
    l_prev = l_sc[...]
    m_cur = jnp.max(s, axis=-1, keepdims=True)        # (H, tq, 1)
    m_next = jnp.maximum(m_prev, m_cur)               # (H, tq, 128)
    m_next1 = m_next[:, :, :1]
    alpha = jnp.exp(m_prev[:, :, :1] - m_next1)       # (H, tq, 1)
    p = jnp.exp(s - m_next1)                          # (H, tq, tkv)

    pv = jnp.stack(
        [jax.lax.dot_general(
            p[h].astype(v.dtype), v[:, h * d_head:(h + 1) * d_head],
            (((1,), (0,)), ((), ())), preferred_element_type=jnp.float32)
         for h in range(n_head)], axis=0)             # (H, tq, D)

    l_sc[...] = alpha * l_prev + jnp.sum(p, axis=-1, keepdims=True)
    acc_sc[...] = alpha * acc_sc[...] + pv
    m_sc[...] = m_next

    @pl.when(ki == pl.num_programs(2) - 1)
    def _finalize():
        inv_l = pl.reciprocal(l_sc[...][:, :, :1], approx=True)   # EUP reciprocal, (H, tq, 1)
        out = acc_sc[...] * inv_l                                  # (H, tq, D)
        # Per-head static lane-slice stores into the (tq, H*D) output block
        # (replaces the old H-way concatenate in the epilogue).
        for h in range(n_head):
            o_ref[:, h * d_head:(h + 1) * d_head] = out[h].astype(o_ref.dtype)


def flash_attention(qkv3, attn_bias, n_head, d_head, *, tq=256, tkv=256):
    """qkv3: (B, T, 3*H*D) packed projections (q|k|v column thirds); attn_bias: (B, 1, T) f32."""
    B, T, three_hd = qkv3.shape
    hd = n_head * d_head
    assert three_hd == 3 * hd
    # TODO(synk): column-third BlockSpecs need lane-aligned heads; pad d_head or fall back to
    #             full-width blocks when n_head * d_head is not a multiple of 128.
    assert hd % 128 == 0, "n_head * d_head must be a multiple of 128 for this kernel"
    tq = _pick_tile(T, tq, 8)
    tkv = _pick_tile(T, tkv, 128)

    kernel = functools.partial(_flash_attn_kernel, n_head=n_head, d_head=d_head)
    return pl.pallas_call(
        kernel,
        out_shape=jax.ShapeDtypeStruct((B, T, hd), qkv3.dtype),
        grid=(B, T // tq, T // tkv),
        in_specs=[
            pl.BlockSpec((None, tq, hd), lambda b, qi, ki: (b, qi, 0)),    # q third
            pl.BlockSpec((None, tkv, hd), lambda b, qi, ki: (b, ki, 1)),   # k third
            pl.BlockSpec((None, tkv, hd), lambda b, qi, ki: (b, ki, 2)),   # v third
            pl.BlockSpec((None, 1, tkv), lambda b, qi, ki: (b, 0, ki)),    # additive mask
        ],
        out_specs=pl.BlockSpec((None, tq, hd), lambda b, qi, ki: (b, qi, 0)),
        scratch_shapes=[
            pltpu.VMEM((n_head, tq, _LANES), jnp.float32),   # running max (lane-replicated)
            pltpu.VMEM((n_head, tq, _LANES), jnp.float32),   # running denom (lane-replicated)
            pltpu.VMEM((n_head, tq, d_head), jnp.float32),   # running numerator
        ],
        compiler_params=pltpu.CompilerParams(
            dimension_semantics=("parallel", "parallel", "arbitrary")),
        cost_estimate=pl.CostEstimate(
            flops=4 * B * n_head * T * T * d_head,
            transcendentals=B * n_head * T * T,
            bytes_accessed=4 * B * T * hd * qkv3.dtype.itemsize + B * T * 4),
    )(qkv3, qkv3, qkv3, attn_bias)


# ----------------------------- Fused o_net + residual + LayerNorm -----------------------------

def _oproj_res_ln_resident_kernel(x_ref, w_ref, res_ref, g_ref, b_ref, o_ref, *, eps):
    y = jnp.dot(x_ref[...], w_ref[...], preferred_element_type=jnp.float32)
    y = y + res_ref[...].astype(jnp.float32)
    mu = jnp.mean(y, axis=-1, keepdims=True)
    yc = y - mu
    var = jnp.mean(yc * yc, axis=-1, keepdims=True)
    o_ref[...] = (yc * jax.lax.rsqrt(var + eps) * g_ref[...] + b_ref[...]).astype(o_ref.dtype)


def _oproj_res_ln_tiled_kernel(x_ref, w_ref, res_ref, g_ref, b_ref, o_ref, acc_ref, *, eps):
    kk = pl.program_id(1)

    @pl.when(kk == 0)
    def _init():
        acc_ref[...] = jnp.zeros_like(acc_ref)

    acc_ref[...] += jnp.dot(x_ref[...], w_ref[...], preferred_element_type=jnp.float32)

    @pl.when(kk == pl.num_programs(1) - 1)
    def _finalize():
        y = acc_ref[...] + res_ref[...].astype(jnp.float32)
        mu = jnp.mean(y, axis=-1, keepdims=True)
        yc = y - mu
        var = jnp.mean(yc * yc, axis=-1, keepdims=True)
        o_ref[...] = (yc * jax.lax.rsqrt(var + eps) * g_ref[...] + b_ref[...]).astype(o_ref.dtype)


def oproj_residual_layernorm(ctx2d, w_o, res2d, gamma, beta, *, eps=1e-5, tm=256, tk=512):
    M, K = ctx2d.shape
    _, N = w_o.shape
    tm = _pick_tile(M, tm, 8)
    cost = pl.CostEstimate(flops=2 * M * N * K, transcendentals=M,
                           bytes_accessed=(M * K + K * N) * 2 + 2 * M * N * 4)

    if K * N * w_o.dtype.itemsize <= _RESIDENT_W_BYTES:
        kernel = functools.partial(_oproj_res_ln_resident_kernel, eps=eps)
        return pl.pallas_call(
            kernel,
            out_shape=jax.ShapeDtypeStruct((M, N), res2d.dtype),
            grid=(M // tm,),
            in_specs=[
                pl.BlockSpec((tm, K), lambda i: (i, 0)),
                pl.BlockSpec((K, N), lambda i: (0, 0)),
                pl.BlockSpec((tm, N), lambda i: (i, 0)),
                pl.BlockSpec((1, N), lambda i: (0, 0)),
                pl.BlockSpec((1, N), lambda i: (0, 0)),
            ],
            out_specs=pl.BlockSpec((tm, N), lambda i: (i, 0)),
            compiler_params=pltpu.CompilerParams(
                dimension_semantics=("parallel",), vmem_limit_bytes=_VMEM_LIMIT),
            cost_estimate=cost,
        )(ctx2d, w_o, res2d, gamma, beta)

    tk = _pick_tile(K, tk, 128)
    kernel = functools.partial(_oproj_res_ln_tiled_kernel, eps=eps)
    return pl.pallas_call(
        kernel,
        out_shape=jax.ShapeDtypeStruct((M, N), res2d.dtype),
        grid=(M // tm, K // tk),
        in_specs=[
            pl.BlockSpec((tm, tk), lambda i, k: (i, k)),
            pl.BlockSpec((tk, N), lambda i, k: (k, 0)),
            pl.BlockSpec((tm, N), lambda i, k: (i, 0)),
            pl.BlockSpec((1, N), lambda i, k: (0, 0)),
            pl.BlockSpec((1, N), lambda i, k: (0, 0)),
        ],
        out_specs=pl.BlockSpec((tm, N), lambda i, k: (i, 0)),
        scratch_shapes=[pltpu.VMEM((tm, N), jnp.float32)],
        compiler_params=pltpu.CompilerParams(
            dimension_semantics=("parallel", "arbitrary"), vmem_limit_bytes=_VMEM_LIMIT),
        cost_estimate=cost,
    )(ctx2d, w_o, res2d, gamma, beta)


# ----------------------------- Module wrapper -----------------------------

class MultiHeadAttnPallas:
    """Pallas-TPU forward pass of roar's MultiHeadAttn (post-norm, no conditioning)."""

    def __init__(self, n_head, d_model, d_head, dropout=0.0, dropatt=0.1,
                 pre_lnorm=False, *, key):
        assert not pre_lnorm  # TODO(synk): pre_lnorm=True path not implemented.
        self.n_head = n_head
        self.d_model = d_model
        self.d_head = d_head
        self.scale = 1.0 / math.sqrt(d_head)
        self.eps = 1e-5
        k1, k2, k3 = jax.random.split(key, 3)
        qkv_dim = 3 * n_head * d_head
        # torch.nn.Linear stores (out, in); we store (in, out) and compute x @ W + b.
        self.w_qkv = jax.random.normal(k1, (d_model, qkv_dim), jnp.float32) * 0.02
        self.b_qkv = jax.random.normal(k2, (1, qkv_dim), jnp.float32) * 0.02
        self.w_o = jax.random.normal(k3, (n_head * d_head, d_model), jnp.float32) * 0.02
        self.ln_gamma = jnp.ones((1, d_model), jnp.float32)
        self.ln_beta = jnp.zeros((1, d_model), jnp.float32)
        # Kernel-side parameters: 1/sqrt(d_head) folded into the Q columns (deletes the per-step
        # VALU scale from the attention inner loop); weights pre-cast to bf16 for the MXU.
        col_scale = jnp.concatenate(
            [jnp.full((n_head * d_head,), self.scale, jnp.float32),
             jnp.ones((2 * n_head * d_head,), jnp.float32)])
        self.w_qkv_kern = (self.w_qkv * col_scale[None, :]).astype(jnp.bfloat16)
        self.b_qkv_kern = self.b_qkv * col_scale[None, :]     # bias stays f32 (added in f32)
        self.w_o_kern = self.w_o.astype(jnp.bfloat16)

    def __call__(self, inp, attn_mask=None, conditioning=None):
        # TODO(synk): dropout / dropatt are identity (inference forward); `conditioning` ignored.
        B, T, C = inp.shape
        H, D = self.n_head, self.d_head
        x2d = inp.reshape(B * T, C)

        qkv = linear_bias(x2d, self.w_qkv_kern, self.b_qkv_kern,
                          out_dtype=jnp.bfloat16)                    # (B*T, 3*H*D) bf16
        qkv3 = qkv.reshape(B, T, 3 * H * D)                          # free reshape: q|k|v thirds

        if attn_mask is None:
            bias = jnp.zeros((B, 1, T), jnp.float32)
        else:
            # F.scaled_dot_product_attention float-mask semantics: additive bias over key
            # positions, broadcast over heads and query positions.
            bias = attn_mask.reshape(B, 1, T).astype(jnp.float32)

        ctx = flash_attention(qkv3, bias, H, D)                      # (B, T, H*D) bf16

        out = oproj_residual_layernorm(
            ctx.reshape(B * T, H * D), self.w_o_kern,
            x2d, self.ln_gamma, self.ln_beta, eps=self.eps)
        return out.reshape(B, T, C)

    # Pure-JAX f32 reference of the same forward pass (for correctness checking).
    def reference(self, inp, attn_mask=None):
        B, T, C = inp.shape
        H, D = self.n_head, self.d_head
        x = inp.reshape(B * T, C)
        qkv = (x @ self.w_qkv + self.b_qkv).reshape(B, T, 3, H, D)
        q = jnp.transpose(qkv[:, :, 0], (0, 2, 1, 3))   # (B, H, T, D)
        k = jnp.transpose(qkv[:, :, 1], (0, 2, 1, 3))
        v = jnp.transpose(qkv[:, :, 2], (0, 2, 1, 3))
        s = jnp.einsum('bhqd,bhkd->bhqk', q, k) * self.scale
        if attn_mask is not None:
            s = s + attn_mask.reshape(B, 1, 1, T).astype(s.dtype)
        p = jax.nn.softmax(s, axis=-1)
        ctx = jnp.einsum('bhqk,bhkd->bhqd', p, v)
        ctx = jnp.transpose(ctx, (0, 2, 1, 3)).reshape(B * T, H * D)
        y = x + ctx @ self.w_o
        mu = jnp.mean(y, axis=-1, keepdims=True)
        var = jnp.mean((y - mu) ** 2, axis=-1, keepdims=True)
        out = (y - mu) * jax.lax.rsqrt(var + self.eps) * self.ln_gamma + self.ln_beta
        return out.reshape(B, T, C)


if __name__ == "__main__":
    key = jax.random.PRNGKey(0)
    k_params, k_inp = jax.random.split(key)

    # TPU-friendly small shapes: n_head*d_head = 128 (one lane tile); T gives 2 q- and 2 kv-tiles
    # so the online-softmax accumulation across kv steps is exercised.
    B, T = 2, 512
    n_head, d_head, d_model = 4, 32, 128

    mod = MultiHeadAttnPallas(n_head, d_model, d_head, dropout=0.1, dropatt=0.1,
                              pre_lnorm=False, key=k_params)
    inp = jax.random.normal(k_inp, (B, T, d_model), jnp.float32)

    # SDPA-style additive float mask: 0 = attend, large negative = masked.
    attn_mask = jnp.zeros((B, T), jnp.float32)
    attn_mask = attn_mask.at[1, T - 64:].set(-1e9).at[1, :32].set(-1e9)

    out = jax.block_until_ready(mod(inp, attn_mask))
    ref = mod.reference(inp, attn_mask)

    assert out.shape == (B, T, d_model)
    max_err = jnp.max(jnp.abs(out - ref))
    assert jnp.allclose(out, ref, rtol=1e-2, atol=1e-2), (
        f"mismatch vs JAX reference: max abs err = {max_err}")

    print("KERNEL_OK")
</pallas_src>

<mosaic_0001>
module attributes {stable_mosaic.version = 11 : i64} {
  func.func @_linear_bias_resident_kernel(%arg0: i32, %arg1: memref<256x128xf32, #tpu.memory_space<vmem>>, %arg2: memref<128x384xbf16, #tpu.memory_space<vmem>>, %arg3: memref<1x384xf32, #tpu.memory_space<vmem>>, %arg4: memref<256x384xbf16, #tpu.memory_space<vmem>>) attributes {dimension_semantics = [#tpu.dimension_semantics<parallel>], iteration_bounds = array<i64: 4>, scalar_prefetch = 0 : i64, scratch_operands = 0 : i64, tpu.core_type = #tpu.core_type<tc>, window_params = [{transform_indices = @transform_0, window_bounds = array<i64: 256, 128>}, {pipeline_mode = #tpu.pipeline_mode<synchronous>, transform_indices = @transform_1, window_bounds = array<i64: 128, 384>}, {pipeline_mode = #tpu.pipeline_mode<synchronous>, transform_indices = @transform_2, window_bounds = array<i64: 1, 384>}, {transform_indices = @transform_3, window_bounds = array<i64: 256, 384>}]} {
    %c0 = arith.constant 0 : index
    %c0_0 = arith.constant 0 : index
    %0 = vector.load %arg1[%c0, %c0_0] : memref<256x128xf32, #tpu.memory_space<vmem>>, vector<256x128xf32>
    %1 = arith.truncf %0 : vector<256x128xf32> to vector<256x128xbf16>
    %c0_1 = arith.constant 0 : index
    %c0_2 = arith.constant 0 : index
    %2 = vector.load %arg2[%c0_1, %c0_2] : memref<128x384xbf16, #tpu.memory_space<vmem>>, vector<128x384xbf16>
    %cst = arith.constant dense<0.000000e+00> : vector<256x384xf32>
    %3 = tpu.matmul %1, %2, %cst {dimension_numbers = #tpu.dot_dimension_numbers<[1], [0], [0], [1], [0, 0, 1, 1], [], []>} : vector<256x128xbf16>, vector<128x384xbf16>, vector<256x384xf32> -> vector<256x384xf32>
    %c0_3 = arith.constant 0 : index
    %c0_4 = arith.constant 0 : index
    %4 = vector.load %arg3[%c0_3, %c0_4] : memref<1x384xf32, #tpu.memory_space<vmem>>, vector<1x384xf32>
    %5 = vector.broadcast %4 : vector<1x384xf32> to vector<256x384xf32>
    %6 = arith.addf %3, %5 : vector<256x384xf32>
    %7 = arith.truncf %6 : vector<256x384xf32> to vector<256x384xbf16>
    %c0_5 = arith.constant 0 : index
    %c0_6 = arith.constant 0 : index
    %8 = vector.load %arg4[%c0_5, %c0_6] : memref<256x384xbf16, #tpu.memory_space<vmem>>, vector<256x384xbf16>
    tpu.vector_store %arg4[%c0_5, %c0_6], %7 {strides = array<i32>} : memref<256x384xbf16, #tpu.memory_space<vmem>>, vector<256x384xbf16>,
    return
  }
  func.func @transform_0(%arg0: i32) -> (i32, i32) {
    %c0_i32 = arith.constant 0 : i32
    %c0_i32_0 = arith.constant 0 : i32
    return %arg0, %c0_i32 : i32, i32
  }
  func.func @transform_1(%arg0: i32) -> (i32, i32) {
    %c0_i32 = arith.constant 0 : i32
    %c0_i32_0 = arith.constant 0 : i32
    %c0_i32_1 = arith.constant 0 : i32
    return %c0_i32, %c0_i32_0 : i32, i32
  }
  func.func @transform_2(%arg0: i32) -> (i32, i32) {
    %c0_i32 = arith.constant 0 : i32
    %c0_i32_0 = arith.constant 0 : i32
    %c0_i32_1 = arith.constant 0 : i32
    return %c0_i32, %c0_i32_0 : i32, i32
  }
  func.func @transform_3(%arg0: i32) -> (i32, i32) {
    %c0_i32 = arith.constant 0 : i32
    %c0_i32_0 = arith.constant 0 : i32
    return %arg0, %c0_i32 : i32, i32
  }
}

</mosaic_0001>

<bundles_post_ra>
// kernel: tpu_custom_call.1
= control target key start
LH: loop header
LB: loop body
LE: loop exit
PB: predicated region body
PF: predicated region fallthrough
CT: control target
= control target key end

     0   :  { %8 = vsyncpa [#allocation3], 0  ;;  %s2223_s0 = inlined_call_operand.hbm [shape: f32[1024,128], index: 0, kind: input, shape index: {}]   ;;  %s2224_s1 = inlined_call_operand.hbm [shape: bf16[128,384], index: 1, kind: input, shape index: {}]   ;;  %s2225_s2 = inlined_call_operand.vmem [shape: f32[1,384], index: 2, kind: input, shape index: {}]   ;;  %s2226_s3 = inlined_call_operand.hbm [shape: bf16[1024,384], index: 3, kind: output, shape index: {}]  }
   0x1   :  { %10 = vsyncpa [#allocation3 + $0x1], 0 }
   0x2   :  { %11 = vsyncpa [#allocation6], 0 }
   0x3   :  { %12 = vsyncpa [#allocation4], 0 }
   0x4   :  { %14 = vsyncpa [#allocation4 + $0x1], 0  ;;  %s1782_s12 = smov 0   ;;  %s1784_s13 = smov 0  }
   0x5   :  { %s1786_s14 = smov 0   ;;  %s1788_s15 = smov 0  }
   0x6 LB: > { %s1803_s16 = sadd.s32 4294967295, %s1750_s15   ;;  %s1268_s17 = sadd.s32 4294967294, %s1750_s15   ;;  %s1750_s15 = sphi %s1788_s15, %s2245_s15   ;;  %s1746_s14 = sphi %s1786_s14, %s2244_s14   ;;  %s1742_s13 = sphi %s1784_s13, %s2243_s13   ;;  %s1738_s12 = sphi %s1782_s12, %s2242_s12  }
   0x7   : > { %p40_p0 = scmp.ne.s32.totalorder %s1742_s13, %s1738_s12  ;;  %p2227_p1 = scmp.eq.s32.totalorder %s1803_s16, 0 }
   0x8   : > { %p112_p3 = scmp.eq.s32.totalorder %s1268_s17, 3  ;;  %p1269_p5 = scmp.ge.s32.totalorder %s1750_s15, 1 }
   0x9   : > { %p1812_p4 = por %p2227_p1, %p40_p0  ;;  %p119_p7 = scmp.lt.s32.totalorder %s1750_s15, 5 }
   0xa   : > { %p1817_p6 = por %p112_p3, %p40_p0  ;;  %s1752_s21 = smov [#allocation5]  }
   0xb   : > { %s2230_s18 = scalar_select %p1812_p4, 1, 0 }
   0xc   : > { %s2231_s19 = scalar_select %p1817_p6, 1, 0 }
   0xd   : > { %p1822_p8 = pnand %p1269_p5, %p119_p7  ;;  %s131_s22 = sshll.u32 %s1752_s21, 4  ;;  %s132_s22 = int_to_ptr.vmem [resolvable:$true] %s131_s22 }
   0xe   : > { %s1835_s24 = sadd.s32 1, %s1750_s15   ;;  %s27_s25 = sadd.s32 1, %s1746_s14 }
   0xf   : > { %s2232_s20 = scalar_select %p1822_p8, 1, 0 }
  0x10   : > { %p1534_p9 = pneg %p1822_p8  ;;  %s24_s26 = ssub.s32 %s1750_s15, %s1835_s24 }
  0x11   : > { %s1622_s29 = scalar_lea.hbm %s2224_s1, 3072 }
  0x12   : > { %p1830_p10 = pnand %p1534_p9, %p2227_p1  ;;  %p1623_p11 = scmp.ne.s32.totalorder %s2224_s1, %s1622_s29 }
  0x13   : > { %p1629_p3 = scmp.lt.u32.totalorder %s1622_s29, %s2224_s1 }
  0x14   : > { %p1624_p12 = pneg %p1830_p10 }
  0x16   : > { %p1625_p13 = pnand %p1624_p12, %p1623_p11 }
  0x18   : > { %p1626_p0 = pneg %p1625_p13 }
  0x1a   : > { %p1631_p5 = pnand %p1629_p3, %p1626_p0 }
  0x1c   : > { %1634 = shalt.err (!%p1631_p5)
}
  0x1d   : > { %s1635_s7 = scalar_lea.vmem %s132_s22, 3072  ;;  %p1643_p2 = scmp.lt.s32.totalorder %s132_s22, %s132_s22 }
  0x1e   : > { %p1636_p7 = scmp.ne.s32.totalorder %s132_s22, %s1635_s7  ;;  %p1644_p6 = scmp.lt.s32.totalorder %s1635_s7, %s1635_s7 }
  0x20   : > { %p1638_p9 = pnand %p1636_p7, %p1624_p12  ;;  %p1645_p4 = por %p1644_p6, %p1643_p2 }
  0x22   : > { %p1639_p1 = pneg %p1638_p9 }
  0x24   : > { %p1646_p8 = pnand %p1645_p4, %p1639_p1 }
  0x26   : > { %1649 = shalt.err (!%p1646_p8)
}
  0x27   : > { %s1753_s8 = smov 192   ;;  %s1754_s9 = smov 12  }
  0x28   : > { %1537 = dma.hbm_to_vmem [thread:$0]  (!%p1830_p10), %s2224_s1, 3072, %s132_s22, [#allocation6], %s1753_s8, %s1753_s8, %s1754_s9  }
  0x29   : > { %p25_p11 = scmp.eq.s32.totalorder %s24_s26, 0  ;;  %p34_p2 = scmp.ne.s32.totalorder %s1746_s14, %s1742_s13 }
  0x2a   : > { %p35_p1 = scmp.eq.s32.totalorder %s1750_s15, 0  ;;  %p1547_p4 = scmp.lt.s32.totalorder %s1750_s15, 4 }
  0x2b   : > { %s1861_s17 = scalar_select %p25_p11, %s1746_s14, %s27_s25  }
  0x2c   : > { %p36_p6 = por %p35_p1, %p34_p2  ;;  %p2234_p8 = scmp.eq.s32.totalorder %s1803_s16, 3 }
  0x2d   : > { %s148_s27 = sand.u32 1, %s1746_s14   ;;  %s1371_s28 = sshll.u32 %s1750_s15, 12 }
  0x2e   : > { %p1865_p12 = por %p2234_p8, %p34_p2  ;;  %s1272_s29 = sshll.u32 %s148_s27, 8 }
  0x2f   : > { %s1874_s4 = scalar_lea.hbm %s2223_s0, %s1371_s28  ;;  %s152_s22 = scalar_lea.vmem [#allocation2], %s1272_s29 }
  0x30   : > { %s159_s25 = sshll.u32 %s152_s22, 4  ;;  %p1876_p10 = pnand %p1547_p4, %p36_p6  ;;  %s1880_s25 = int_to_ptr.vmem [resolvable:$true] %s159_s25 }
  0x31   : > { %s1882_s5 = scalar_lea.sflag [#allocation3], %s148_s27  ;;  %s1650_s6 = scalar_lea.hbm %s1874_s4, 4096 }
  0x32   : > { %p1651_p13 = scmp.ne.s32.totalorder %s1874_s4, %s1650_s6  ;;  %p1652_p0 = pneg %p1876_p10 }
  0x33   : > { %s1655_s9 = scalar_lea.hbm %s2223_s0, 16384  ;;  %p1656_p7 = scmp.lt.u32.totalorder %s1874_s4, %s2223_s0 }
  0x34   : > { %p1653_p3 = pnand %p1652_p0, %p1651_p13  ;;  %p1657_p9 = scmp.lt.u32.totalorder %s1655_s9, %s1650_s6 }
  0x35   : > { %p1659_p2 = scmp.lt.u32.totalorder %s1650_s6, %s1874_s4 }
  0x36   : > { %p1654_p5 = pneg %p1653_p3  ;;  %p1658_p11 = por %p1657_p9, %p1656_p7 }
  0x38   : > { %p1660_p1 = por %p1659_p2, %p1658_p11 }
  0x3a   : > { %p1661_p4 = pnand %p1660_p1, %p1654_p5 }
  0x3c   : > { %1664 = shalt.err (!%p1661_p4)
}
  0x3d   : > { %s1665_s27 = scalar_lea.vmem %s1880_s25, 4096  ;;  %s1755_s28 = smov [#allocation2]  }
  0x3e   : > { %p1666_p6 = scmp.ne.s32.totalorder %s1880_s25, %s1665_s27  ;;  %s1670_s29 = sshll.u32 %s1755_s28, 4  ;;  %s1671_s29 = int_to_ptr.vmem [resolvable:$false] %s1670_s29 }
  0x3f   : > { %s1672_s23 = scalar_lea.vmem %s1671_s29, 8192  ;;  %p1673_p3 = scmp.lt.s32.totalorder %s1880_s25, %s1671_s29 }
  0x40   : > { %p1668_p8 = pnand %p1666_p6, %p1652_p0  ;;  %p1674_p7 = scmp.lt.s32.totalorder %s1672_s23, %s1665_s27 }
  0x42   : > { %p1669_p13 = pneg %p1668_p8  ;;  %p1675_p9 = por %p1674_p7, %p1673_p3 }
  0x44   : > { %p1676_p11 = pnand %p1675_p9, %p1669_p13 }
  0x46   : > { %1679 = shalt.err (!%p1676_p11)
}
  0x47   : > { %s1756_s30 = smov 128   ;;  %s1757_s22 = smov 8  }
  0x48   : > { %1541 = dma.hbm_to_vmem [thread:$0]  (!%p1876_p10), %s1874_s4, 4096, %s1880_s25, %s1882_s5, %s1756_s30, %s1756_s30, %s1757_s22  }
  0x49   : > { %p2237_p0 = scmp.ne.s32.totalorder %s2232_s20, 0 }
  0x4a   : > { %s1913_s6 = sand.u32 (!%p2237_p0), 1, %s1742_s13   ;;  %p2238_p5 = scmp.ne.s32.totalorder (!%p2237_p0), %s2230_s18, 0 }
  0x4b   : > { %171 = sbr.rel (%p2237_p0) target bundleno = 442 (0x1ba), region = 32  ;;  %s1276_s7 = sshll.u32 (!%p2237_p0), %s1913_s6, 8 }
  0x4c   : > { %s174_s8 = scalar_lea.sflag (!%p2237_p0), [#allocation3], %s1913_s6  ;;  %s1917_s9 = scalar_lea.vmem (!%p2237_p0), [#allocation2], %s1276_s7 }
  0x52   : > { %1725 = dma.done.wait (%p2238_p5), %s174_s8, 4096  }
  0x53   : > { %1727 = vsyncadd (%p2238_p5), %s174_s8, 4294963200  ;;  %p2239_p10 = scmp.eq.s32.totalorder %s1803_s16, 0 }
  0x55   : > { %1729 = dma.done.wait (%p2239_p10), [#allocation6], 3072   ;;  %p2240_p2 = pmov %p2239_p10 }
  0x56   : > { %v1758_v0 = vmov 0   ;;  %v1590_v1 = vld [vmem:[#allocation5 + $0x4] ss:$12 sps:$4 sm:$0xff]   ;;  %v1592_v2 = vld [vmem:[#allocation5] ss:$12 sps:$4 sm:$0xff]   ;;  %v210_v26 = vld [vmem:[%s1917_s9 + $0x18] sm:$0xff] }
  0x57   : > { %1731 = vsyncadd (%p2240_p2), [#allocation6], 4294964224  ;;  %464 = vmatprep.mubr.bf16.mxu0 %v1758_v0  ;;  %584 = vmatprep.mubr.bf16.mxu1 %v1758_v0  ;;  %v1593_v3 = vld [vmem:[#allocation5 + $0x1c] ss:$12 sps:$4 sm:$0xff]   ;;  %v1595_v4 = vld [vmem:[#allocation5 + $0x18] ss:$12 sps:$4 sm:$0xff]  }
  0x58   : > { %432 = vmatprep.subr.bf16.mxu0 %v1590_v1  ;;  %1508 = vmatprep.subr.bf16.mxu1 %v1590_v1  ;;  %v1596_v5 = vld [vmem:[#allocation5 + $0x34] ss:$12 sps:$4 sm:$0xff]   ;;  %v1598_v6 = vld [vmem:[#allocation5 + $0x30] ss:$12 sps:$4 sm:$0xff]   ;;  %v1599_v7 = vld [vmem:[#allocation5 + $0x4c] ss:$12 sps:$4 sm:$0xff]  }
  0x59   : > { %433 = vmatpush1.bf16.msra.mxu0 %v1592_v2  ;;  %1516 = vmatpush1.bf16.msra.mxu1 %v1592_v2  ;;  %v1601_v8 = vld [vmem:[#allocation5 + $0x48] ss:$12 sps:$4 sm:$0xff]   ;;  %v1602_v9 = vld [vmem:[#allocation5 + $0x64] ss:$12 sps:$4 sm:$0xff]   ;;  %v1604_v10 = vld [vmem:[#allocation5 + $0x60] ss:$12 sps:$4 sm:$0xff]  }
  0x5a   : > { %434 = vmatprep.subr.bf16.mxu0 %v1593_v3  ;;  %1509 = vmatprep.subr.bf16.mxu1 %v1593_v3  ;;  %v1605_v11 = vld [vmem:[#allocation5 + $0x7c] ss:$12 sps:$4 sm:$0xff]   ;;  %v1607_v12 = vld [vmem:[#allocation5 + $0x78] ss:$12 sps:$4 sm:$0xff]   ;;  %v1608_v13 = vld [vmem:[#allocation5 + $0x94] ss:$12 sps:$4 sm:$0xff]  }
  0x5b   : > { %v1610_v14 = vld [vmem:[#allocation5 + $0x90] ss:$12 sps:$4 sm:$0xff]   ;;  %v1611_v15 = vld [vmem:[#allocation5 + $0xac] ss:$12 sps:$4 sm:$0xff]   ;;  %v1613_v16 = vld [vmem:[#allocation5 + $0xa8] ss:$12 sps:$4 sm:$0xff]  }
  0x5c   : > { %v207_v17 = vld [vmem:[%s1917_s9] sm:$0xff]  ;;  %v208_v18 = vld [vmem:[%s1917_s9 + $0x8] sm:$0xff]  ;;  %v209_v25 = vld [vmem:[%s1917_s9 + $0x10] sm:$0xff]  ;;  %s1524_s4 = smul.u32 384, %s1913_s6  ;;  %s1171_s27 = scalar_lea.sflag [#allocation4], %s1913_s6 }
  0x5d   : > { %435 = vmatpush1.bf16.msra.mxu0 %v1595_v4  ;;  %1517 = vmatpush1.bf16.msra.mxu1 %v1595_v4  ;;  %v231_v19 = vld [vmem:[%s1917_s9 + $0xc0] sm:$0xff]  ;;  %v232_v20 = vld [vmem:[%s1917_s9 + $0xc8] sm:$0xff]  ;;  %v239_v22 = vpack.c.bf16 %v208_v18, %v207_v17  ;;  %v233_v27 = vld [vmem:[%s1917_s9 + $0xd0] sm:$0xff]  ;;  %v240_v30 = vpack.c.bf16 %v210_v26, %v209_v25  ;;  %s1525_s26 = smul.u32 6144, %s1803_s16  ;;  %s1759_s29 = smov [#allocation7]  }
  0x5e   : > { %436 = vmatprep.subr.bf16.mxu0 %v1596_v5  ;;  %1510 = vmatprep.subr.bf16.mxu1 %v1596_v5  ;;  %v1614_v21 = vld [vmem:[#allocation5 + $0x8] ss:$12 sps:$4 sm:$0xff]   ;;  %v1933_v23 = vpack.c.bf16 %v232_v20, %v231_v19  ;;  %v1615_v24 = vld [vmem:[#allocation5 + $0x20] ss:$12 sps:$4 sm:$0xff]   ;;  %v234_v28 = vld [vmem:[%s1917_s9 + $0xd8] sm:$0xff]  ;;  %s2015_s25 = scalar_lea.vmem [#allocation7], %s1524_s4 }
  0x5f   : > { %v1616_v29 = vld [vmem:[#allocation5 + $0x38] ss:$12 sps:$4 sm:$0xff]   ;;  %v1942_v31 = vpack.c.bf16 %v234_v28, %v233_v27  ;;  %v1617_v32 = vld [vmem:[#allocation5 + $0x50] ss:$12 sps:$4 sm:$0xff]   ;;  %v212_v34 = vld [vmem:[%s1917_s9 + $0x28] sm:$0xff]  ;;  %s1185_s5 = sshll.u32 %s2015_s25, 4  ;;  %s2173_s11 = scalar_lea.hbm %s2226_s3, %s1525_s26  ;;  %s2175_s5 = int_to_ptr.vmem [resolvable:$true] %s1185_s5 }
  0x60   : > { %v211_v33 = vld [vmem:[%s1917_s9 + $0x20] sm:$0xff]  ;;  %v236_v36 = vld [vmem:[%s1917_s9 + $0xe8] sm:$0xff]  ;;  %v213_v41 = vld [vmem:[%s1917_s9 + $0x30] sm:$0xff]  ;;  %s1680_s28 = scalar_lea.vmem %s2175_s5, 6144  ;;  %s1684_s23 = sshll.u32 %s1759_s29, 4  ;;  %s1685_s23 = int_to_ptr.vmem [resolvable:$false] %s1684_s23 }
  0x61   : > { %437 = vmatpush1.bf16.msra.mxu0 %v1598_v6  ;;  %1518 = vmatpush1.bf16.msra.mxu1 %v1598_v6  ;;  %v235_v35 = vld [vmem:[%s1917_s9 + $0xe0] sm:$0xff]  ;;  %v1618_v37 = vld [vmem:[#allocation5 + $0x68] ss:$12 sps:$4 sm:$0xff]   ;;  %v241_v38 = vpack.c.bf16 %v212_v34, %v211_v33  ;;  %v214_v42 = vld [vmem:[%s1917_s9 + $0x38] sm:$0xff]  ;;  %p1681_p1 = scmp.ne.s32.totalorder %s2175_s5, %s1680_s28  ;;  %s1686_s30 = scalar_lea.vmem %s1685_s23, 12288 }
  0x62   : > { %438 = vmatprep.subr.bf16.mxu0 %v1599_v7  ;;  %1511 = vmatprep.subr.bf16.mxu1 %v1599_v7  ;;  %v1951_v39 = vpack.c.bf16 %v236_v36, %v235_v35  ;;  %v1619_v40 = vld [vmem:[#allocation5 + $0x80] ss:$12 sps:$4 sm:$0xff]   ;;  %v237_v43 = vld [vmem:[%s1917_s9 + $0xf0] sm:$0xff]  ;;  %v238_v44 = vld [vmem:[%s1917_s9 + $0xf8] sm:$0xff]  ;;  %v242_v46 = vpack.c.bf16 %v214_v42, %v213_v41  ;;  %p1687_p8 = scmp.lt.s32.totalorder %s2175_s5, %s1685_s23  ;;  %p1688_p13 = scmp.lt.s32.totalorder %s1686_s30, %s1680_s28 }
  0x63   : > { %v1620_v45 = vld [vmem:[#allocation5 + $0x98] ss:$12 sps:$4 sm:$0xff]   ;;  %v1960_v47 = vpack.c.bf16 %v238_v44, %v237_v43  ;;  %v1621_v48 = vld [vmem:[#allocation5 + $0xb0] ss:$12 sps:$4 sm:$0xff]   ;;  %v216_v50 = vld [vmem:[%s1917_s9 + $0x48] sm:$0xff]  ;;  %p1682_p4 = pnand %p1681_p1, %p1865_p12 }
  0x64   : > { %v215_v49 = vld [vmem:[%s1917_s9 + $0x40] sm:$0xff]  ;;  %v217_v52 = vld [vmem:[%s1917_s9 + $0x50] sm:$0xff]  ;;  %v218_v53 = vld [vmem:[%s1917_s9 + $0x58] sm:$0xff]  ;;  %p1689_p3 = por %p1688_p13, %p1687_p8 }
  0x65   : > { %439 = vmatpush1.bf16.msra.mxu0 %v1601_v8  ;;  %1519 = vmatpush1.bf16.msra.mxu1 %v1601_v8  ;;  %v243_v51 = vpack.c.bf16 %v216_v50, %v215_v49  ;;  %v244_v54 = vpack.c.bf16 %v218_v53, %v217_v52  ;;  %v219_v55 = vld [vmem:[%s1917_s9 + $0x60] sm:$0xff]  ;;  %v220_v56 = vld [vmem:[%s1917_s9 + $0x68] sm:$0xff]  ;;  %v221_v58 = vld [vmem:[%s1917_s9 + $0x70] sm:$0xff]  ;;  %p1683_p6 = pneg %p1682_p4 }
  0x66   : > { %440 = vmatprep.subr.bf16.mxu0 %v1602_v9  ;;  %1512 = vmatprep.subr.bf16.mxu1 %v1602_v9  ;;  %v245_v57 = vpack.c.bf16 %v220_v56, %v219_v55  ;;  %v222_v59 = vld [vmem:[%s1917_s9 + $0x78] sm:$0xff]  ;;  %v223_v60 = vld [vmem:[%s1917_s9 + $0x80] sm:$0xff]  ;;  %v224_v61 = vld [vmem:[%s1917_s9 + $0x88] sm:$0xff] }
  0x67   : > { %v246_v62 = vpack.c.bf16 %v222_v59, %v221_v58  ;;  %v247_v63 = vpack.c.bf16 %v224_v61, %v223_v60  ;;  %v225_v1 = vld [vmem:[%s1917_s9 + $0x90] sm:$0xff]  ;;  %v226_v2 = vld [vmem:[%s1917_s9 + $0x98] sm:$0xff]  ;;  %v227_v3 = vld [vmem:[%s1917_s9 + $0xa0] sm:$0xff]  ;;  %p1690_p7 = pnand %p1689_p3, %p1683_p6 }
  0x68   : > { %v228_v4 = vld [vmem:[%s1917_s9 + $0xa8] sm:$0xff]  ;;  %v248_v5 = vpack.c.bf16 %v226_v2, %v225_v1  ;;  %v229_v7 = vld [vmem:[%s1917_s9 + $0xb0] sm:$0xff]  ;;  %v230_v8 = vld [vmem:[%s1917_s9 + $0xb8] sm:$0xff] }
  0x69   : > { %441 = vmatpush1.bf16.msra.mxu0 %v1604_v10  ;;  %1520 = vmatpush1.bf16.msra.mxu1 %v1604_v10  ;;  %v249_v6 = vpack.c.bf16 %v228_v4, %v227_v3  ;;  %v250_v9 = vpack.c.bf16 %v230_v8, %v229_v7  ;;  %v289_v10 = vlaneseq }
  0x6a   : > { %442 = vmatprep.subr.bf16.mxu0 %v1605_v11  ;;  %1513 = vmatprep.subr.bf16.mxu1 %v1605_v11 }
  0x6b   : > { %v1991_v11 = vshrl.u32 %v289_v10, 7 }
  0x6d   : > { %443 = vmatpush1.bf16.msra.mxu0 %v1607_v12  ;;  %1521 = vmatpush1.bf16.msra.mxu1 %v1607_v12  ;;  %v291_v12 = vsub.s32 0, %v1991_v11 }
  0x6e   : > { %444 = vmatprep.subr.bf16.mxu0 %v1608_v13  ;;  %1514 = vmatprep.subr.bf16.mxu1 %v1608_v13  ;;  %v1997_v13 = vld [vmem:[%s2225_s2] sm:$0x7] }
  0x71   : > { %445 = vmatpush1.bf16.msra.mxu0 %v1610_v14  ;;  %1522 = vmatpush1.bf16.msra.mxu1 %v1610_v14  ;;  %v295_v14 = vsub.s32 1, %v1991_v11 }
  0x72   : > { %446 = vmatprep.subr.bf16.mxu0 %v1611_v15  ;;  %1515 = vmatprep.subr.bf16.mxu1 %v1611_v15  ;;  %v2001_v15 = vrot.slane %v1997_v13, %v291_v12 }
  0x75   : > { %447 = vmatpush1.bf16.msra.mxu0 %v1613_v16  ;;  %1523 = vmatpush1.bf16.msra.mxu1 %v1613_v16 }
  0x76   : > { %1460 = vmatprep.subr.bf16.mxu1 %v1614_v21 }
  0x78   : > { %465 = vmatmul.mubr.bf16.vlgmr.msra.gmra.mrb[0].mxu0 %v239_v22  ;;  %585 = vmatmul.mubr.bf16.vlgmr.msra.gmra.mrb[0].mxu1 %v1933_v23 }
  0x79   : > { %1461 = vmatpush3.bf16.msra.mxu1 %v1614_v21  ;;  %474 = vmatprep.mubr.bf16.mxu0 %v1758_v0 }
  0x7a   : > { %1462 = vmatprep.subr.bf16.mxu1 %v1615_v24  ;;  %594 = vmatprep.mubr.bf16.mxu1 %v1758_v0 }
  0x7d   : > { %1463 = vmatpush3.bf16.msra.mxu1 %v1615_v24 }
  0x7e   : > { %1464 = vmatprep.subr.bf16.mxu1 %v1616_v29 }
  0x80   : > { %475 = vmatmul.mubr.bf16.gmra.mrb[4].mxu0 %v240_v30  ;;  %595 = vmatmul.mubr.bf16.gmra.mrb[4].mxu1 %v1942_v31 }
  0x81   : > { %1465 = vmatpush3.bf16.msra.mxu1 %v1616_v29  ;;  %484 = vmatprep.mubr.bf16.mxu0 %v1758_v0 }
  0x82   : > { %1466 = vmatprep.subr.bf16.mxu1 %v1617_v32  ;;  %604 = vmatprep.mubr.bf16.mxu1 %v1758_v0 }
  0x85   : > { %1467 = vmatpush3.bf16.msra.mxu1 %v1617_v32 }
  0x86   : > { %1468 = vmatprep.subr.bf16.mxu1 %v1618_v37 }
  0x88   : > { %485 = vmatmul.mubr.bf16.gmra.mrb[8].mxu0 %v241_v38  ;;  %605 = vmatmul.mubr.bf16.gmra.mrb[8].mxu1 %v1951_v39 }
  0x89   : > { %1469 = vmatpush3.bf16.msra.mxu1 %v1618_v37  ;;  %494 = vmatprep.mubr.bf16.mxu0 %v1758_v0 }
  0x8a   : > { %1470 = vmatprep.subr.bf16.mxu1 %v1619_v40  ;;  %614 = vmatprep.mubr.bf16.mxu1 %v1758_v0 }
  0x8d   : > { %1471 = vmatpush3.bf16.msra.mxu1 %v1619_v40 }
  0x8e   : > { %1472 = vmatprep.subr.bf16.mxu1 %v1620_v45 }
  0x90   : > { %495 = vmatmul.mubr.bf16.gmra.mrb[12].mxu0 %v242_v46  ;;  %615 = vmatmul.mubr.bf16.gmra.mrb[12].mxu1 %v1960_v47 }
  0x91   : > { %1473 = vmatpush3.bf16.msra.mxu1 %v1620_v45  ;;  %504 = vmatprep.mubr.bf16.mxu0 %v1758_v0 }
  0x92   : > { %1474 = vmatprep.subr.bf16.mxu1 %v1621_v48  ;;  %1476 = vmatprep.mubr.bf16.mxu1 %v239_v22 }
  0x95   : > { %1475 = vmatpush3.bf16.msra.mxu1 %v1621_v48 }
  0x98   : > { %505 = vmatmul.mubr.bf16.gmra.mrb[16].mxu0 %v243_v51  ;;  %1477 = vmatmul.mubr.bf16.vlgmr.msra.gmra.mrb[16].mxu1 %v240_v30 }
  0x99   : > { %514 = vmatprep.mubr.bf16.mxu0 %v1758_v0  ;;  %1480 = vmatprep.mubr.bf16.mxu1 %v241_v38 }
  0xa0   : > { %515 = vmatmul.mubr.bf16.gmra.mrb[20].mxu0 %v244_v54  ;;  %1481 = vmatmul.mubr.bf16.gmra.mrb[20].mxu1 %v242_v46 }
  0xa1   : > { %524 = vmatprep.mubr.bf16.mxu0 %v1758_v0  ;;  %1484 = vmatprep.mubr.bf16.mxu1 %v243_v51 }
  0xa8   : > { %525 = vmatmul.mubr.bf16.gmra.mrb[24].mxu0 %v245_v57  ;;  %1485 = vmatmul.mubr.bf16.gmra.mrb[24].mxu1 %v244_v54 }
  0xa9   : > { %534 = vmatprep.mubr.bf16.mxu0 %v1758_v0  ;;  %1488 = vmatprep.mubr.bf16.mxu1 %v245_v57 }
  0xb0   : > { %535 = vmatmul.mubr.bf16.gmra.mrb[28].mxu0 %v246_v62  ;;  %1489 = vmatmul.mubr.bf16.gmra.mrb[28].mxu1 %v246_v62 }
  0xb1   : > { %544 = vmatprep.mubr.bf16.mxu0 %v1758_v0  ;;  %1492 = vmatprep.mubr.bf16.mxu1 %v247_v63 }
  0xb8   : > { %545 = vmatmul.mubr.bf16.gmra.mrb[32].mxu0 %v247_v63  ;;  %1493 = vmatmul.mubr.bf16.gmra.mrb[32].mxu1 %v248_v5 }
  0xb9   : > { %554 = vmatprep.mubr.bf16.mxu0 %v1758_v0  ;;  %1496 = vmatprep.mubr.bf16.mxu1 %v249_v6 }
  0xc0   : > { %555 = vmatmul.mubr.bf16.gmra.mrb[36].mxu0 %v248_v5  ;;  %1497 = vmatmul.mubr.bf16.gmra.mrb[36].mxu1 %v250_v9 }
  0xc1   : > { %564 = vmatprep.mubr.bf16.mxu0 %v1758_v0  ;;  %1500 = vmatprep.mubr.bf16.mxu1 %v1933_v23 }
  0xc8   : > { %565 = vmatmul.mubr.bf16.gmra.mrb[40].mxu0 %v249_v6  ;;  %1501 = vmatmul.mubr.bf16.gmra.mrb[40].mxu1 %v1942_v31 }
  0xc9   : > { %574 = vmatprep.mubr.bf16.mxu0 %v1758_v0  ;;  %1504 = vmatprep.mubr.bf16.mxu1 %v1951_v39  ;;  %v2004_v0 = vrot.slane %v1997_v13, %v295_v14 }
  0xd0   : > { %575 = vmatmul.mubr.bf16.gmra.mrb[44].mxu0 %v250_v9  ;;  %1505 = vmatmul.mubr.bf16.gmra.mrb[44].mxu1 %v1960_v47 }
 0x14b   : > { %v466_v16 = vpop.f32.mrb[0].mxu0  ;;  %v586_v17 = vpop.f32.mrb[0].mxu1 }
 0x14c   : > { %v467_v18 = vadd.f32 %v466_v16, %v2001_v15  ;;  %v587_v19 = vadd.f32 %v586_v17, %v2001_v15  ;;  %v468_v20 = vpop.f32.mrb[1].mxu0  ;;  %v588_v21 = vpop.f32.mrb[1].mxu1 }
 0x14d   : > { %v469_v22 = vadd.f32 %v468_v20, %v2004_v0  ;;  %v589_v23 = vadd.f32 %v588_v21, %v2004_v0  ;;  %v470_v24 = vpop.f32.mrb[2].mxu0  ;;  %v590_v25 = vpop.f32.mrb[2].mxu1 }
 0x14e   : > { %v471_v26 = vadd.f32 %v470_v24, %v2001_v15  ;;  %v591_v27 = vadd.f32 %v590_v25, %v2001_v15  ;;  %v472_v28 = vpop.f32.mrb[3].mxu0  ;;  %v592_v29 = vpop.f32.mrb[3].mxu1 }
 0x14f   : > { %v1372_v30 = vpack.c.bf16 %v469_v22, %v467_v18  ;;  %v1420_v31 = vpack.c.bf16 %v589_v23, %v587_v19  ;;  %v473_v32 = vadd.f32 %v472_v28, %v2004_v0  ;;  %v593_v33 = vadd.f32 %v592_v29, %v2004_v0 }
 0x150   : > { %v299_v22 = vsub.s32 2, %v1991_v11 }
 0x151   : > { %1106 = vst [vmem:[%s2015_s25] sm:$0xff] %v1372_v30  ;;  %1154 = vst [vmem:[%s2015_s25 + $0x120] sm:$0xff] %v1420_v31  ;;  %v1374_v34 = vpack.c.bf16 %v473_v32, %v471_v26  ;;  %v1422_v35 = vpack.c.bf16 %v593_v33, %v591_v27 }
 0x153   : > { %1108 = vst [vmem:[%s2015_s25 + $0xc] sm:$0xff] %v1374_v34  ;;  %1156 = vst [vmem:[%s2015_s25 + $0x12c] sm:$0xff] %v1422_v35  ;;  %v476_v36 = vpop.f32.mrb[4].mxu0  ;;  %v596_v37 = vpop.f32.mrb[4].mxu1  ;;  %v2055_v34 = vrot.slane %v1997_v13, %v299_v22 }
 0x154   : > { %v477_v38 = vadd.f32 %v476_v36, %v2001_v15  ;;  %v597_v39 = vadd.f32 %v596_v37, %v2001_v15  ;;  %v478_v40 = vpop.f32.mrb[5].mxu0  ;;  %v598_v41 = vpop.f32.mrb[5].mxu1 }
 0x155   : > { %v479_v42 = vadd.f32 %v478_v40, %v2004_v0  ;;  %v599_v43 = vadd.f32 %v598_v41, %v2004_v0  ;;  %v480_v44 = vpop.f32.mrb[6].mxu0  ;;  %v600_v45 = vpop.f32.mrb[6].mxu1 }
 0x156   : > { %v481_v46 = vadd.f32 %v480_v44, %v2001_v15  ;;  %v601_v47 = vadd.f32 %v600_v45, %v2001_v15  ;;  %v482_v48 = vpop.f32.mrb[7].mxu0  ;;  %v602_v49 = vpop.f32.mrb[7].mxu1 }
 0x157   : > { %v1376_v50 = vpack.c.bf16 %v479_v42, %v477_v38  ;;  %v1424_v51 = vpack.c.bf16 %v599_v43, %v597_v39  ;;  %v483_v52 = vadd.f32 %v482_v48, %v2004_v0  ;;  %v603_v53 = vadd.f32 %v602_v49, %v2004_v0 }
 0x159   : > { %1110 = vst [vmem:[%s2015_s25 + $0x18] sm:$0xff] %v1376_v50  ;;  %1158 = vst [vmem:[%s2015_s25 + $0x138] sm:$0xff] %v1424_v51  ;;  %v1378_v54 = vpack.c.bf16 %v483_v52, %v481_v46  ;;  %v1426_v55 = vpack.c.bf16 %v603_v53, %v601_v47 }
 0x15b   : > { %1112 = vst [vmem:[%s2015_s25 + $0x24] sm:$0xff] %v1378_v54  ;;  %1160 = vst [vmem:[%s2015_s25 + $0x144] sm:$0xff] %v1426_v55  ;;  %v486_v56 = vpop.f32.mrb[8].mxu0  ;;  %v606_v57 = vpop.f32.mrb[8].mxu1 }
 0x15c   : > { %v487_v58 = vadd.f32 %v486_v56, %v2001_v15  ;;  %v607_v59 = vadd.f32 %v606_v57, %v2001_v15  ;;  %v488_v60 = vpop.f32.mrb[9].mxu0  ;;  %v608_v61 = vpop.f32.mrb[9].mxu1 }
 0x15d   : > { %v489_v62 = vadd.f32 %v488_v60, %v2004_v0  ;;  %v609_v63 = vadd.f32 %v608_v61, %v2004_v0  ;;  %v490_v1 = vpop.f32.mrb[10].mxu0  ;;  %v610_v2 = vpop.f32.mrb[10].mxu1 }
 0x15e   : > { %v491_v3 = vadd.f32 %v490_v1, %v2001_v15  ;;  %v611_v4 = vadd.f32 %v610_v2, %v2001_v15  ;;  %v492_v5 = vpop.f32.mrb[11].mxu0  ;;  %v612_v6 = vpop.f32.mrb[11].mxu1 }
 0x15f   : > { %v1380_v7 = vpack.c.bf16 %v489_v62, %v487_v58  ;;  %v1428_v8 = vpack.c.bf16 %v609_v63, %v607_v59  ;;  %v493_v9 = vadd.f32 %v492_v5, %v2004_v0  ;;  %v613_v10 = vadd.f32 %v612_v6, %v2004_v0 }
 0x161   : > { %1114 = vst [vmem:[%s2015_s25 + $0x30] sm:$0xff] %v1380_v7  ;;  %1162 = vst [vmem:[%s2015_s25 + $0x150] sm:$0xff] %v1428_v8  ;;  %v1382_v12 = vpack.c.bf16 %v493_v9, %v491_v3  ;;  %v1430_v14 = vpack.c.bf16 %v613_v10, %v611_v4 }
 0x163   : > { %1116 = vst [vmem:[%s2015_s25 + $0x3c] sm:$0xff] %v1382_v12  ;;  %1164 = vst [vmem:[%s2015_s25 + $0x15c] sm:$0xff] %v1430_v14  ;;  %v496_v16 = vpop.f32.mrb[12].mxu0  ;;  %v616_v17 = vpop.f32.mrb[12].mxu1 }
 0x164   : > { %v497_v18 = vadd.f32 %v496_v16, %v2001_v15  ;;  %v617_v19 = vadd.f32 %v616_v17, %v2001_v15  ;;  %v498_v20 = vpop.f32.mrb[13].mxu0  ;;  %v618_v21 = vpop.f32.mrb[13].mxu1 }
 0x165   : > { %v499_v23 = vadd.f32 %v498_v20, %v2004_v0  ;;  %v619_v24 = vadd.f32 %v618_v21, %v2004_v0  ;;  %v500_v25 = vpop.f32.mrb[14].mxu0  ;;  %v620_v26 = vpop.f32.mrb[14].mxu1 }
 0x166   : > { %v501_v27 = vadd.f32 %v500_v25, %v2001_v15  ;;  %v621_v28 = vadd.f32 %v620_v26, %v2001_v15  ;;  %v502_v29 = vpop.f32.mrb[15].mxu0  ;;  %v622_v30 = vpop.f32.mrb[15].mxu1 }
 0x167   : > { %v1384_v31 = vpack.c.bf16 %v499_v23, %v497_v18  ;;  %v1432_v32 = vpack.c.bf16 %v619_v24, %v617_v19  ;;  %v503_v33 = vadd.f32 %v502_v29, %v2004_v0  ;;  %v623_v11 = vadd.f32 %v622_v30, %v2004_v0 }
 0x169   : > { %1118 = vst [vmem:[%s2015_s25 + $0x48] sm:$0xff] %v1384_v31  ;;  %1166 = vst [vmem:[%s2015_s25 + $0x168] sm:$0xff] %v1432_v32  ;;  %v1386_v35 = vpack.c.bf16 %v503_v33, %v501_v27  ;;  %v1434_v36 = vpack.c.bf16 %v623_v11, %v621_v28 }
 0x16b   : > { %1120 = vst [vmem:[%s2015_s25 + $0x54] sm:$0xff] %v1386_v35  ;;  %1168 = vst [vmem:[%s2015_s25 + $0x174] sm:$0xff] %v1434_v36  ;;  %v506_v37 = vpop.f32.mrb[16].mxu0  ;;  %v1478_v38 = vpop.f32.mrb[16].mxu1 }
 0x16c   : > { %v507_v39 = vadd.f32 %v506_v37, %v2001_v15  ;;  %v668_v40 = vadd.f32 %v1478_v38, %v2055_v34  ;;  %v508_v41 = vpop.f32.mrb[17].mxu0  ;;  %v659_v42 = vpop.f32.mrb[17].mxu1 }
 0x16d   : > { %v509_v43 = vadd.f32 %v508_v41, %v2004_v0  ;;  %v660_v13 = vadd.f32 %v659_v42, %v2055_v34  ;;  %v510_v44 = vpop.f32.mrb[18].mxu0  ;;  %v1479_v45 = vpop.f32.mrb[18].mxu1 }
 0x16e   : > { %v1377_v46 = vpack.c.bf16 %v668_v40, %v668_v40  ;;  %v511_v47 = vadd.f32 %v510_v44, %v2001_v15  ;;  %v671_v48 = vadd.f32 %v1479_v45, %v2055_v34  ;;  %v512_v49 = vpop.f32.mrb[19].mxu0  ;;  %v662_v50 = vpop.f32.mrb[19].mxu1 }
 0x16f   : > { %v1388_v51 = vpack.c.bf16 %v509_v43, %v507_v39  ;;  %v1373_v52 = vpack.c.bf16 %v660_v13, %v660_v13  ;;  %v513_v53 = vadd.f32 %v512_v49, %v2004_v0  ;;  %v663_v54 = vadd.f32 %v662_v50, %v2055_v34 }
 0x170   : > { %1111 = vst [vmem:[%s2015_s25 + $0x20] sm:$0xf] %v1377_v46  ;;  %v1379_v55 = vpack.c.bf16 %v671_v48, %v671_v48 }
 0x171   : > { %1122 = vst [vmem:[%s2015_s25 + $0x60] sm:$0xff] %v1388_v51  ;;  %1107 = vst [vmem:[%s2015_s25 + $0x8] sm:$0xf] %v1373_v52  ;;  %v1390_v56 = vpack.c.bf16 %v513_v53, %v511_v47  ;;  %v1375_v57 = vpack.c.bf16 %v663_v54, %v663_v54 }
 0x172   : > { %1113 = vst [vmem:[%s2015_s25 + $0x2c] sm:$0xf] %v1379_v55 }
 0x173   : > { %1124 = vst [vmem:[%s2015_s25 + $0x6c] sm:$0xff] %v1390_v56  ;;  %1109 = vst [vmem:[%s2015_s25 + $0x14] sm:$0xf] %v1375_v57  ;;  %v516_v58 = vpop.f32.mrb[20].mxu0  ;;  %v1482_v59 = vpop.f32.mrb[20].mxu1 }
 0x174   : > { %v517_v60 = vadd.f32 %v516_v58, %v2001_v15  ;;  %v684_v61 = vadd.f32 %v1482_v59, %v2055_v34  ;;  %v518_v62 = vpop.f32.mrb[21].mxu0  ;;  %v675_v63 = vpop.f32.mrb[21].mxu1 }
 0x175   : > { %v519_v1 = vadd.f32 %v518_v62, %v2004_v0  ;;  %v676_v2 = vadd.f32 %v675_v63, %v2055_v34  ;;  %v520_v3 = vpop.f32.mrb[22].mxu0  ;;  %v1483_v4 = vpop.f32.mrb[22].mxu1 }
 0x176   : > { %v1385_v5 = vpack.c.bf16 %v684_v61, %v684_v61  ;;  %v521_v6 = vadd.f32 %v520_v3, %v2001_v15  ;;  %v687_v7 = vadd.f32 %v1483_v4, %v2055_v34  ;;  %v522_v8 = vpop.f32.mrb[23].mxu0  ;;  %v678_v9 = vpop.f32.mrb[23].mxu1 }
 0x177   : > { %v1392_v10 = vpack.c.bf16 %v519_v1, %v517_v60  ;;  %v1381_v12 = vpack.c.bf16 %v676_v2, %v676_v2  ;;  %v523_v14 = vadd.f32 %v522_v8, %v2004_v0  ;;  %v679_v16 = vadd.f32 %v678_v9, %v2055_v34 }
 0x178   : > { %1119 = vst [vmem:[%s2015_s25 + $0x50] sm:$0xf] %v1385_v5  ;;  %v1387_v17 = vpack.c.bf16 %v687_v7, %v687_v7 }
 0x179   : > { %1126 = vst [vmem:[%s2015_s25 + $0x78] sm:$0xff] %v1392_v10  ;;  %1115 = vst [vmem:[%s2015_s25 + $0x38] sm:$0xf] %v1381_v12  ;;  %v1394_v18 = vpack.c.bf16 %v523_v14, %v521_v6  ;;  %v1383_v19 = vpack.c.bf16 %v679_v16, %v679_v16 }
 0x17a   : > { %1121 = vst [vmem:[%s2015_s25 + $0x5c] sm:$0xf] %v1387_v17 }
 0x17b   : > { %1128 = vst [vmem:[%s2015_s25 + $0x84] sm:$0xff] %v1394_v18  ;;  %1117 = vst [vmem:[%s2015_s25 + $0x44] sm:$0xf] %v1383_v19  ;;  %v526_v20 = vpop.f32.mrb[24].mxu0  ;;  %v1486_v21 = vpop.f32.mrb[24].mxu1 }
 0x17c   : > { %v527_v22 = vadd.f32 %v526_v20, %v2001_v15  ;;  %v700_v23 = vadd.f32 %v1486_v21, %v2055_v34  ;;  %v528_v24 = vpop.f32.mrb[25].mxu0  ;;  %v691_v25 = vpop.f32.mrb[25].mxu1 }
 0x17d   : > { %v529_v26 = vadd.f32 %v528_v24, %v2004_v0  ;;  %v692_v27 = vadd.f32 %v691_v25, %v2055_v34  ;;  %v530_v28 = vpop.f32.mrb[26].mxu0  ;;  %v1487_v29 = vpop.f32.mrb[26].mxu1 }
 0x17e   : > { %v1393_v30 = vpack.c.bf16 %v700_v23, %v700_v23  ;;  %v531_v31 = vadd.f32 %v530_v28, %v2001_v15  ;;  %v703_v32 = vadd.f32 %v1487_v29, %v2055_v34  ;;  %v532_v33 = vpop.f32.mrb[27].mxu0  ;;  %v694_v11 = vpop.f32.mrb[27].mxu1 }
 0x17f   : > { %v1396_v35 = vpack.c.bf16 %v529_v26, %v527_v22  ;;  %v1389_v36 = vpack.c.bf16 %v692_v27, %v692_v27  ;;  %v533_v37 = vadd.f32 %v532_v33, %v2004_v0  ;;  %v695_v38 = vadd.f32 %v694_v11, %v2055_v34 }
 0x180   : > { %1127 = vst [vmem:[%s2015_s25 + $0x80] sm:$0xf] %v1393_v30  ;;  %v1395_v39 = vpack.c.bf16 %v703_v32, %v703_v32 }
 0x181   : > { %1130 = vst [vmem:[%s2015_s25 + $0x90] sm:$0xff] %v1396_v35  ;;  %1123 = vst [vmem:[%s2015_s25 + $0x68] sm:$0xf] %v1389_v36  ;;  %v1398_v40 = vpack.c.bf16 %v533_v37, %v531_v31  ;;  %v1391_v41 = vpack.c.bf16 %v695_v38, %v695_v38 }
 0x182   : > { %1129 = vst [vmem:[%s2015_s25 + $0x8c] sm:$0xf] %v1395_v39 }
 0x183   : > { %1132 = vst [vmem:[%s2015_s25 + $0x9c] sm:$0xff] %v1398_v40  ;;  %1125 = vst [vmem:[%s2015_s25 + $0x74] sm:$0xf] %v1391_v41  ;;  %v536_v42 = vpop.f32.mrb[28].mxu0  ;;  %v1490_v43 = vpop.f32.mrb[28].mxu1 }
 0x184   : > { %v537_v13 = vadd.f32 %v536_v42, %v2001_v15  ;;  %v716_v44 = vadd.f32 %v1490_v43, %v2055_v34  ;;  %v538_v45 = vpop.f32.mrb[29].mxu0  ;;  %v707_v46 = vpop.f32.mrb[29].mxu1 }
 0x185   : > { %v539_v47 = vadd.f32 %v538_v45, %v2004_v0  ;;  %v708_v48 = vadd.f32 %v707_v46, %v2055_v34  ;;  %v540_v49 = vpop.f32.mrb[30].mxu0  ;;  %v1491_v50 = vpop.f32.mrb[30].mxu1 }
 0x186   : > { %v1401_v51 = vpack.c.bf16 %v716_v44, %v716_v44  ;;  %v541_v52 = vadd.f32 %v540_v49, %v2001_v15  ;;  %v719_v53 = vadd.f32 %v1491_v50, %v2055_v34  ;;  %v542_v54 = vpop.f32.mrb[31].mxu0  ;;  %v710_v55 = vpop.f32.mrb[31].mxu1 }
 0x187   : > { %v1400_v56 = vpack.c.bf16 %v539_v47, %v537_v13  ;;  %v1397_v57 = vpack.c.bf16 %v708_v48, %v708_v48  ;;  %v543_v58 = vadd.f32 %v542_v54, %v2004_v0  ;;  %v711_v59 = vadd.f32 %v710_v55, %v2055_v34 }
 0x188   : > { %1135 = vst [vmem:[%s2015_s25 + $0xb0] sm:$0xf] %v1401_v51  ;;  %v1403_v60 = vpack.c.bf16 %v719_v53, %v719_v53 }
 0x189   : > { %1134 = vst [vmem:[%s2015_s25 + $0xa8] sm:$0xff] %v1400_v56  ;;  %1131 = vst [vmem:[%s2015_s25 + $0x98] sm:$0xf] %v1397_v57  ;;  %v1402_v61 = vpack.c.bf16 %v543_v58, %v541_v52  ;;  %v1399_v62 = vpack.c.bf16 %v711_v59, %v711_v59 }
 0x18a   : > { %1137 = vst [vmem:[%s2015_s25 + $0xbc] sm:$0xf] %v1403_v60 }
 0x18b   : > { %1136 = vst [vmem:[%s2015_s25 + $0xb4] sm:$0xff] %v1402_v61  ;;  %1133 = vst [vmem:[%s2015_s25 + $0xa4] sm:$0xf] %v1399_v62  ;;  %v546_v63 = vpop.f32.mrb[32].mxu0  ;;  %v1494_v1 = vpop.f32.mrb[32].mxu1 }
 0x18c   : > { %v547_v2 = vadd.f32 %v546_v63, %v2001_v15  ;;  %v732_v3 = vadd.f32 %v1494_v1, %v2055_v34  ;;  %v548_v4 = vpop.f32.mrb[33].mxu0  ;;  %v723_v5 = vpop.f32.mrb[33].mxu1 }
 0x18d   : > { %v549_v6 = vadd.f32 %v548_v4, %v2004_v0  ;;  %v724_v7 = vadd.f32 %v723_v5, %v2055_v34  ;;  %v550_v8 = vpop.f32.mrb[34].mxu0  ;;  %v1495_v9 = vpop.f32.mrb[34].mxu1 }
 0x18e   : > { %v1409_v10 = vpack.c.bf16 %v732_v3, %v732_v3  ;;  %v551_v12 = vadd.f32 %v550_v8, %v2001_v15  ;;  %v735_v14 = vadd.f32 %v1495_v9, %v2055_v34  ;;  %v552_v16 = vpop.f32.mrb[35].mxu0  ;;  %v726_v17 = vpop.f32.mrb[35].mxu1 }
 0x18f   : > { %v1404_v18 = vpack.c.bf16 %v549_v6, %v547_v2  ;;  %v1405_v19 = vpack.c.bf16 %v724_v7, %v724_v7  ;;  %v553_v20 = vadd.f32 %v552_v16, %v2004_v0  ;;  %v727_v21 = vadd.f32 %v726_v17, %v2055_v34 }
 0x190   : > { %1143 = vst [vmem:[%s2015_s25 + $0xe0] sm:$0xf] %v1409_v10  ;;  %v1411_v22 = vpack.c.bf16 %v735_v14, %v735_v14 }
 0x191   : > { %1138 = vst [vmem:[%s2015_s25 + $0xc0] sm:$0xff] %v1404_v18  ;;  %1139 = vst [vmem:[%s2015_s25 + $0xc8] sm:$0xf] %v1405_v19  ;;  %v1406_v23 = vpack.c.bf16 %v553_v20, %v551_v12  ;;  %v1407_v24 = vpack.c.bf16 %v727_v21, %v727_v21 }
 0x192   : > { %1145 = vst [vmem:[%s2015_s25 + $0xec] sm:$0xf] %v1411_v22 }
 0x193   : > { %1140 = vst [vmem:[%s2015_s25 + $0xcc] sm:$0xff] %v1406_v23  ;;  %1141 = vst [vmem:[%s2015_s25 + $0xd4] sm:$0xf] %v1407_v24  ;;  %v556_v25 = vpop.f32.mrb[36].mxu0  ;;  %v1498_v26 = vpop.f32.mrb[36].mxu1 }
 0x194   : > { %v557_v27 = vadd.f32 %v556_v25, %v2001_v15  ;;  %v748_v28 = vadd.f32 %v1498_v26, %v2055_v34  ;;  %v558_v29 = vpop.f32.mrb[37].mxu0  ;;  %v739_v30 = vpop.f32.mrb[37].mxu1 }
 0x195   : > { %v559_v31 = vadd.f32 %v558_v29, %v2004_v0  ;;  %v740_v32 = vadd.f32 %v739_v30, %v2055_v34  ;;  %v560_v33 = vpop.f32.mrb[38].mxu0  ;;  %v1499_v11 = vpop.f32.mrb[38].mxu1 }
 0x196   : > { %v1417_v35 = vpack.c.bf16 %v748_v28, %v748_v28  ;;  %v561_v36 = vadd.f32 %v560_v33, %v2001_v15  ;;  %v751_v37 = vadd.f32 %v1499_v11, %v2055_v34  ;;  %v562_v38 = vpop.f32.mrb[39].mxu0  ;;  %v742_v39 = vpop.f32.mrb[39].mxu1 }
 0x197   : > { %v1408_v40 = vpack.c.bf16 %v559_v31, %v557_v27  ;;  %v1413_v41 = vpack.c.bf16 %v740_v32, %v740_v32  ;;  %v563_v42 = vadd.f32 %v562_v38, %v2004_v0  ;;  %v743_v43 = vadd.f32 %v742_v39, %v2055_v34 }
 0x198   : > { %1151 = vst [vmem:[%s2015_s25 + $0x110] sm:$0xf] %v1417_v35  ;;  %v1419_v13 = vpack.c.bf16 %v751_v37, %v751_v37 }
 0x199   : > { %1142 = vst [vmem:[%s2015_s25 + $0xd8] sm:$0xff] %v1408_v40  ;;  %1147 = vst [vmem:[%s2015_s25 + $0xf8] sm:$0xf] %v1413_v41  ;;  %v1410_v44 = vpack.c.bf16 %v563_v42, %v561_v36  ;;  %v1415_v45 = vpack.c.bf16 %v743_v43, %v743_v43 }
 0x19a   : > { %1153 = vst [vmem:[%s2015_s25 + $0x11c] sm:$0xf] %v1419_v13 }
 0x19b   : > { %1144 = vst [vmem:[%s2015_s25 + $0xe4] sm:$0xff] %v1410_v44  ;;  %1149 = vst [vmem:[%s2015_s25 + $0x104] sm:$0xf] %v1415_v45  ;;  %v566_v46 = vpop.f32.mrb[40].mxu0  ;;  %v1502_v47 = vpop.f32.mrb[40].mxu1 }
 0x19c   : > { %v567_v48 = vadd.f32 %v566_v46, %v2001_v15  ;;  %v764_v49 = vadd.f32 %v1502_v47, %v2055_v34  ;;  %v568_v50 = vpop.f32.mrb[41].mxu0  ;;  %v755_v51 = vpop.f32.mrb[41].mxu1 }
 0x19d   : > { %v569_v52 = vadd.f32 %v568_v50, %v2004_v0  ;;  %v756_v53 = vadd.f32 %v755_v51, %v2055_v34  ;;  %v570_v54 = vpop.f32.mrb[42].mxu0  ;;  %v1503_v55 = vpop.f32.mrb[42].mxu1 }
 0x19e   : > { %v1425_v56 = vpack.c.bf16 %v764_v49, %v764_v49  ;;  %v571_v57 = vadd.f32 %v570_v54, %v2001_v15  ;;  %v767_v58 = vadd.f32 %v1503_v55, %v2055_v34  ;;  %v572_v59 = vpop.f32.mrb[43].mxu0  ;;  %v758_v60 = vpop.f32.mrb[43].mxu1 }
 0x19f   : > { %v1412_v61 = vpack.c.bf16 %v569_v52, %v567_v48  ;;  %v1421_v62 = vpack.c.bf16 %v756_v53, %v756_v53  ;;  %v573_v63 = vadd.f32 %v572_v59, %v2004_v0  ;;  %v759_v1 = vadd.f32 %v758_v60, %v2055_v34 }
 0x1a0   : > { %1159 = vst [vmem:[%s2015_s25 + $0x140] sm:$0xf] %v1425_v56  ;;  %v1427_v2 = vpack.c.bf16 %v767_v58, %v767_v58 }
 0x1a1   : > { %1146 = vst [vmem:[%s2015_s25 + $0xf0] sm:$0xff] %v1412_v61  ;;  %1155 = vst [vmem:[%s2015_s25 + $0x128] sm:$0xf] %v1421_v62  ;;  %v1414_v3 = vpack.c.bf16 %v573_v63, %v571_v57  ;;  %v1423_v4 = vpack.c.bf16 %v759_v1, %v759_v1 }
 0x1a2   : > { %1161 = vst [vmem:[%s2015_s25 + $0x14c] sm:$0xf] %v1427_v2 }
 0x1a3   : > { %1148 = vst [vmem:[%s2015_s25 + $0xfc] sm:$0xff] %v1414_v3  ;;  %1157 = vst [vmem:[%s2015_s25 + $0x134] sm:$0xf] %v1423_v4  ;;  %v576_v5 = vpop.f32.mrb[44].mxu0  ;;  %v1506_v6 = vpop.f32.mrb[44].mxu1 }
 0x1a4   : > { %v577_v7 = vadd.f32 %v576_v5, %v2001_v15  ;;  %v780_v8 = vadd.f32 %v1506_v6, %v2055_v34  ;;  %v578_v9 = vpop.f32.mrb[45].mxu0  ;;  %v771_v10 = vpop.f32.mrb[45].mxu1 }
 0x1a5   : > { %v579_v12 = vadd.f32 %v578_v9, %v2004_v0  ;;  %v772_v14 = vadd.f32 %v771_v10, %v2055_v34  ;;  %v580_v16 = vpop.f32.mrb[46].mxu0  ;;  %v1507_v17 = vpop.f32.mrb[46].mxu1 }
 0x1a6   : > { %v1433_v18 = vpack.c.bf16 %v780_v8, %v780_v8  ;;  %v581_v19 = vadd.f32 %v580_v16, %v2001_v15  ;;  %v783_v20 = vadd.f32 %v1507_v17, %v2055_v34  ;;  %v582_v21 = vpop.f32.mrb[47].mxu0  ;;  %v774_v22 = vpop.f32.mrb[47].mxu1 }
 0x1a7   : > { %v1416_v23 = vpack.c.bf16 %v579_v12, %v577_v7  ;;  %v1429_v24 = vpack.c.bf16 %v772_v14, %v772_v14  ;;  %v583_v25 = vadd.f32 %v582_v21, %v2004_v0  ;;  %v775_v26 = vadd.f32 %v774_v22, %v2055_v34 }
 0x1a8   : > { %1167 = vst [vmem:[%s2015_s25 + $0x170] sm:$0xf] %v1433_v18  ;;  %v1435_v27 = vpack.c.bf16 %v783_v20, %v783_v20 }
 0x1a9   : > { %1150 = vst [vmem:[%s2015_s25 + $0x108] sm:$0xff] %v1416_v23  ;;  %1163 = vst [vmem:[%s2015_s25 + $0x158] sm:$0xf] %v1429_v24  ;;  %v1418_v15 = vpack.c.bf16 %v583_v25, %v581_v19  ;;  %v1431_v28 = vpack.c.bf16 %v775_v26, %v775_v26 }
 0x1aa   : > { %1169 = vst [vmem:[%s2015_s25 + $0x17c] sm:$0xf] %v1435_v27 }
 0x1ab   : > { %1152 = vst [vmem:[%s2015_s25 + $0x114] sm:$0xff] %v1418_v15  ;;  %1165 = vst [vmem:[%s2015_s25 + $0x164] sm:$0xf] %v1431_v28 }
 0x1ac   : > { %1693 = shalt.err (!%p1690_p7)
}
 0x1ad   : > { %s1694_s22 = scalar_lea.hbm %s2173_s11, 6144  ;;  %s1698_s9 = scalar_lea.hbm %s2226_s3, 24576 }
 0x1ae   : > { %p1695_p9 = scmp.ne.s32.totalorder %s2173_s11, %s1694_s22  ;;  %p1699_p5 = scmp.lt.u32.totalorder %s2173_s11, %s2226_s3 }
 0x1af   : > { %p1700_p10 = scmp.lt.u32.totalorder %s1698_s9, %s1694_s22  ;;  %p1702_p1 = scmp.lt.u32.totalorder %s1694_s22, %s2173_s11 }
 0x1b0   : > { %p1696_p11 = pnand %p1695_p9, %p1865_p12 }
 0x1b1   : > { %p1701_p2 = por %p1700_p10, %p1699_p5 }
 0x1b2   : > { %p1697_p0 = pneg %p1696_p11 }
 0x1b3   : > { %p1703_p4 = por %p1702_p1, %p1701_p2 }
 0x1b5   : > { %p1704_p6 = pnand %p1703_p4, %p1697_p0 }
 0x1b7   : > { %1707 = shalt.err (!%p1704_p6)
}
 0x1b8   : > { %s1760_s4 = smov 192   ;;  %s1761_s25 = smov 12  }
 0x1b9   : > { %1532 = dma.vmem_to_hbm [thread:$0]  (%p1865_p12), %s2175_s5, 6144, %s2173_s11, %s1171_s27, %s1760_s4, %s1760_s4, %s1761_s25  }
 0x1ba PF: > { %p1549_p8 = scmp.ge.s32.totalorder %s1750_s15, 2  ;;  %s1200_s26 = sand.u32 1, %s1738_s12  }
 0x1bb   : > { %p2241_p13 = scmp.ne.s32.totalorder %s2231_s19, 0  ;;  %s1201_s16 = scalar_lea.sflag [#allocation4], %s1200_s26 }
 0x1bd   : > { %p1543_p3 = pnand %p1549_p8, %p2241_p13 }
 0x1bf   : > { %1733 = dma.done.wait (!%p1543_p3), %s1201_s16, 6144  }
 0x1c0   : > { %1735 = vsyncadd (!%p1543_p3), %s1201_s16, 4294961152  ;;  %p17_p7 = scmp.ge.s32.totalorder %s1835_s24, 6   ;;  %s2242_s12 = smov %s1742_s13 }
 0x1c1   : > { %s2243_s13 = smov %s1746_s14  ;;  %s2244_s14 = smov %s1861_s17 }
 0x1c2   : > { %s2245_s15 = smov %s1835_s24  ;;  %19 = sbr.rel (!%p17_p7) target bundleno = 6 (0x6), region = 81 }
 0x1c9   :  { %1206 = vsyncpa [#allocation3], 1 }
 0x1ca   :  { %1208 = vsyncpa [#allocation3 + $0x1], 1 }
 0x1cb   :  { %1209 = vsyncpa [#allocation6], 1 }
 0x1cc   :  { %1210 = vsyncpa [#allocation4], 1 }
 0x1cd   :  { %1212 = vsyncpa [#allocation4 + $0x1], 1 }

</bundles_post_ra>
